<compile_context>
chip_gen: v7x
topology: tpu7x:2x2x1
jax: 0.10.0
libtpu: 0.0.40
codegen_flags: <defaults>
</compile_context>

<pallas_src>
import functools
import math

import jax
import jax.numpy as jnp
from jax.experimental import pallas as pl
from jax.experimental.pallas import tpu as pltpu


def _round_up(a: int, b: int) -> int:
    return ((a + b - 1) // b) * b


@functools.lru_cache(maxsize=1)
def _vmem_budget_bytes() -> int:
    """Generation-aware usable VMEM budget (leaves headroom for Mosaic scratch)."""
    phys = 64 * 1024 * 1024  # conservative default == v7x per-TC VMEM
    try:
        phys = int(pltpu.get_tpu_info().vmem_capacity_bytes)
    except Exception:
        pass
    # ~70% of physical: ~45 MiB on v7x (64 MiB), ~90 MiB on v5e/v6e (128 MiB).
    return min(int(phys * 0.70), 96 * 1024 * 1024)


def _lm_head_kernel(x_ref, w_ref, o_ref):
    # x_ref: (tm, K) activations, w_ref: (K, tn) weight already in (hidden, vocab)
    # layout -> natural MXU feed, f32 accumulation inside the MXU, single store.
    o_ref[...] = jnp.dot(
        x_ref[...], w_ref[...], preferred_element_type=jnp.float32
    ).astype(o_ref.dtype)


def _lm_head_kernel_ktiled(x_ref, w_ref, o_ref, acc_ref):
    # Fallback for very large hidden: K is tiled, f32 VMEM accumulator.
    @pl.when(pl.program_id(2) == 0)
    def _():
        acc_ref[...] = jnp.zeros_like(acc_ref)

    acc_ref[...] += jnp.dot(
        x_ref[...], w_ref[...], preferred_element_type=jnp.float32
    )

    @pl.when(pl.program_id(2) == pl.num_programs(2) - 1)
    def _():
        o_ref[...] = acc_ref[...].astype(o_ref.dtype)


@functools.partial(jax.jit, static_argnames=("tile_m", "tile_n", "tile_k"))
def mask_filling_forward(x, weight, *, tile_m=512, tile_n=1024, tile_k=4096):
    """lm_head forward: logits = x @ weight.T

    x:      (..., hidden)
    weight: (vocab_size, hidden)   -- PyTorch nn.Linear layout
    returns (..., vocab_size) in x.dtype
    """
    *lead, hidden = x.shape
    vocab_size, hidden_w = weight.shape
    assert hidden == hidden_w, "hidden dims of x and weight must match"

    m = int(math.prod(lead)) if lead else 1
    x2d = x.reshape(m, hidden)
    out_dtype = x.dtype

    xi = jnp.dtype(x.dtype).itemsize
    wi = jnp.dtype(weight.dtype).itemsize
    oi = jnp.dtype(out_dtype).itemsize

    budget = _vmem_budget_bytes()

    # ---- tile derivation (all static at trace time) ----
    tm = min(tile_m, _round_up(m, 8))                 # sublane axis: multiple of 8
    tn = min(tile_n, _round_up(vocab_size, 128))      # lane axis: multiple of 128

    def footprint(tm_, tn_, tk_, k_tiled_):
        b = 2 * (tm_ * tk_ * xi + tk_ * tn_ * wi + tm_ * tn_ * oi)  # double-buffered
        if k_tiled_:
            b += tm_ * tn_ * 4                                       # f32 accumulator
        return b

    # Prefer un-tiled K: activation tile stays resident across the vocab sweep.
    tk = hidden
    k_tiled = False
    while footprint(tm, tn, tk, False) > budget and (tm > 8 or tn > 128):
        # Shrink whichever tile currently costs more VMEM.
        x_cost = tm * tk * xi
        w_cost = tk * tn * wi
        if (w_cost >= x_cost and tn > 128) or tm <= 8:
            tn = max(128, (tn // 2 // 128) * 128)
        else:
            tm = max(8, (tm // 2 // 8) * 8)

    wt = weight.T  # (hidden, vocab): natural (K, N) MXU layout; one-time copy.
    # TODO(synk): callers that can store the lm_head weight as (hidden, vocab)
    # should pass it pre-transposed to skip this per-call 2*|W| HBM copy.

    if footprint(tm, tn, tk, False) > budget:
        # Hidden too large for a resident K tile: tile the reduction.
        k_tiled = True
        tk = min(tile_k, _round_up(hidden, 128))
        tk = max(128, (tk // 128) * 128)
        while footprint(tm, tn, tk, True) > budget and tk > 512:
            tk = max(512, (tk // 2 // 128) * 128)
        # K must be zero-padded for correctness (OOB K would corrupt real logits).
        k_pad = _round_up(hidden, tk)
        if k_pad != hidden:
            x2d = jnp.pad(x2d, ((0, 0), (0, k_pad - hidden)))
            wt = jnp.pad(wt, ((0, k_pad - hidden), (0, 0)))
    else:
        k_pad = hidden

    m_grid = pl.cdiv(m, tm)
    n_grid = pl.cdiv(vocab_size, tn)

    # ---- truthful cost estimate for the chosen schedule ----
    x_bytes = m * hidden * xi
    w_bytes = vocab_size * hidden * wi
    out_bytes = m * vocab_size * oi
    cost = pl.CostEstimate(
        flops=2 * m * hidden * vocab_size,
        transcendentals=0,
        bytes_accessed=(
            x_bytes * (1 if not k_tiled else n_grid)
            + w_bytes * m_grid
            + out_bytes
        ),
    )

    if not k_tiled:
        out2d = pl.pallas_call(
            _lm_head_kernel,
            out_shape=jax.ShapeDtypeStruct((m, vocab_size), out_dtype),
            grid_spec=pltpu.PrefetchScalarGridSpec(
                num_scalar_prefetch=0,
                grid=(m_grid, n_grid),
                in_specs=[
                    # (tm, hidden) activation tile: constant across j -> no re-DMA.
                    pl.BlockSpec((tm, hidden), lambda i, j: (i, 0)),
                    # (hidden, tn) weight slab in natural MXU layout.
                    pl.BlockSpec((hidden, tn), lambda i, j: (0, j)),
                ],
                out_specs=pl.BlockSpec((tm, tn), lambda i, j: (i, j)),
            ),
            compiler_params=pltpu.CompilerParams(
                dimension_semantics=("parallel", "parallel"),
                vmem_limit_bytes=budget,
            ),
            cost_estimate=cost,
        )(x2d, wt)
    else:
        out2d = pl.pallas_call(
            _lm_head_kernel_ktiled,
            out_shape=jax.ShapeDtypeStruct((m, vocab_size), out_dtype),
            grid_spec=pltpu.PrefetchScalarGridSpec(
                num_scalar_prefetch=0,
                grid=(m_grid, n_grid, k_pad // tk),
                in_specs=[
                    pl.BlockSpec((tm, tk), lambda i, j, k: (i, k)),
                    pl.BlockSpec((tk, tn), lambda i, j, k: (k, j)),
                ],
                out_specs=pl.BlockSpec((tm, tn), lambda i, j, k: (i, j)),
                scratch_shapes=[pltpu.VMEM((tm, tn), jnp.float32)],
            ),
            compiler_params=pltpu.CompilerParams(
                dimension_semantics=("parallel", "parallel", "arbitrary"),
                vmem_limit_bytes=budget,
            ),
            cost_estimate=cost,
        )(x2d, wt)

    return out2d.reshape(*lead, vocab_size)


if __name__ == "__main__":
    key = jax.random.PRNGKey(0)

    # ---- Test 1: small aligned shapes, f32 ----
    batch, seq, hidden, vocab_size = 2, 8, 32, 256
    k1, k2, k3, k4 = jax.random.split(key, 4)

    x = jax.random.normal(k1, (batch, seq, hidden), dtype=jnp.float32)
    bound = 1.0 / (hidden ** 0.5)
    weight = jax.random.uniform(
        k2, (vocab_size, hidden), dtype=jnp.float32, minval=-bound, maxval=bound
    )

    logits = mask_filling_forward(x, weight)
    jax.block_until_ready(logits)
    ref = jnp.einsum("bsh,vh->bsv", x, weight, precision="highest")
    assert logits.shape == (batch, seq, vocab_size)
    assert jnp.allclose(logits, ref, atol=1e-2, rtol=1e-2)

    # ---- Test 2: ragged shapes (M not mult of 8, vocab not mult of 128) ----
    b2, s2, h2, v2 = 1, 10, 48, 321
    x2 = jax.random.normal(k3, (b2, s2, h2), dtype=jnp.float32)
    w2 = jax.random.uniform(
        k4, (v2, h2), dtype=jnp.float32,
        minval=-1.0 / (h2 ** 0.5), maxval=1.0 / (h2 ** 0.5),
    )
    logits2 = mask_filling_forward(x2, w2)
    jax.block_until_ready(logits2)
    ref2 = jnp.einsum("bsh,vh->bsv", x2, w2, precision="highest")
    assert logits2.shape == (b2, s2, v2)
    assert jnp.allclose(logits2, ref2, atol=1e-2, rtol=1e-2)

    # ---- Test 3: bf16 inputs (halved weight streaming), f32 MXU accumulation ----
    logits_bf16 = mask_filling_forward(
        x.astype(jnp.bfloat16), weight.astype(jnp.bfloat16)
    )
    jax.block_until_ready(logits_bf16)
    ref_bf16 = jnp.einsum(
        "bsh,vh->bsv",
        x.astype(jnp.bfloat16).astype(jnp.float32),
        weight.astype(jnp.bfloat16).astype(jnp.float32),
        precision="highest",
    )
    assert jnp.allclose(
        logits_bf16.astype(jnp.float32), ref_bf16, atol=5e-2, rtol=5e-2
    )

    print("KERNEL_OK")
</pallas_src>

<mosaic_0001>
module attributes {stable_mosaic.version = 11 : i64} {
  func.func @_lm_head_kernel(%arg0: i32, %arg1: i32, %arg2: memref<16x32xf32, #tpu.memory_space<vmem>>, %arg3: memref<32x256xf32, #tpu.memory_space<vmem>>, %arg4: memref<16x256xf32, #tpu.memory_space<vmem>>) attributes {dimension_semantics = [#tpu.dimension_semantics<parallel>, #tpu.dimension_semantics<parallel>], iteration_bounds = array<i64: 1, 1>, scalar_prefetch = 0 : i64, scratch_operands = 0 : i64, tpu.core_type = #tpu.core_type<tc>, window_params = [{transform_indices = @transform_0, window_bounds = array<i64: 16, 32>}, {transform_indices = @transform_1, window_bounds = array<i64: 32, 256>}, {transform_indices = @transform_2, window_bounds = array<i64: 16, 256>}]} {
    %c0 = arith.constant 0 : index
    %c0_0 = arith.constant 0 : index
    %0 = vector.load %arg2[%c0, %c0_0] : memref<16x32xf32, #tpu.memory_space<vmem>>, vector<16x32xf32>
    %c0_1 = arith.constant 0 : index
    %c0_2 = arith.constant 0 : index
    %1 = vector.load %arg3[%c0_1, %c0_2] : memref<32x256xf32, #tpu.memory_space<vmem>>, vector<32x256xf32>
    %cst = arith.constant dense<0.000000e+00> : vector<16x256xf32>
    %2 = tpu.matmul %0, %1, %cst {dimension_numbers = #tpu.dot_dimension_numbers<[1], [0], [0], [1], [0, 0, 1, 1], [], []>} : vector<16x32xf32>, vector<32x256xf32>, vector<16x256xf32> -> vector<16x256xf32>
    %c0_3 = arith.constant 0 : index
    %c0_4 = arith.constant 0 : index
    %3 = vector.load %arg4[%c0_3, %c0_4] : memref<16x256xf32, #tpu.memory_space<vmem>>, vector<16x256xf32>
    tpu.vector_store %arg4[%c0_3, %c0_4], %2 {strides = array<i32>} : memref<16x256xf32, #tpu.memory_space<vmem>>, vector<16x256xf32>,
    return
  }
  func.func @transform_0(%arg0: i32, %arg1: i32) -> (i32, i32) {
    %c0_i32 = arith.constant 0 : i32
    %c0_i32_0 = arith.constant 0 : i32
    return %arg0, %c0_i32 : i32, i32
  }
  func.func @transform_1(%arg0: i32, %arg1: i32) -> (i32, i32) {
    %c0_i32 = arith.constant 0 : i32
    %c0_i32_0 = arith.constant 0 : i32
    return %c0_i32, %arg1 : i32, i32
  }
  func.func @transform_2(%arg0: i32, %arg1: i32) -> (i32, i32) {
    %c0_i32 = arith.constant 0 : i32
    return %arg0, %arg1 : i32, i32
  }
}

</mosaic_0001>

<bundles_post_ra>
// kernel: mask_filling_forward.1
= control target key start
LH: loop header
LB: loop body
LE: loop exit
PB: predicated region body
PF: predicated region fallthrough
CT: control target
= control target key end

     0   :  { %7 = vsyncpa [#allocation3], 0  ;;  %s315_s0 = inlined_call_operand.hbm [shape: f32[16,32], index: 0, kind: input, shape index: {}]   ;;  %s316_s1 = inlined_call_operand.hbm [shape: f32[32,256], index: 1, kind: input, shape index: {}]   ;;  %s317_s2 = inlined_call_operand.hbm [shape: f32[16,256], index: 2, kind: output, shape index: {}]  }
   0x1   :  { %8 = vsyncpa [#allocation6], 0 }
   0x2   :  { %9 = vsyncpa [#allocation4], 0  ;;  %s250_s9 = smov [#allocation2]   ;;  %s178_s13 = scalar_lea.hbm %s315_s0, 256 }
   0x3   :  { %s15_s10 = sshll.u32 %s250_s9, 4  ;;  %p179_p0 = scmp.ne.s32.totalorder %s315_s0, %s178_s13  ;;  %s16_s10 = int_to_ptr.vmem [resolvable:$true] %s15_s10 }
   0x4   :  { %p182_p1 = scmp.lt.u32.totalorder %s178_s13, %s315_s0 }
   0x6   :  { %p184_p2 = pnand %p182_p1, %p179_p0 }
   0x8   :  { %187 = shalt.err (!%p184_p2)
}
   0x9   :  { %s188_s18 = scalar_lea.vmem %s16_s10, 256  ;;  %p193_p4 = scmp.lt.s32.totalorder %s16_s10, %s16_s10 }
   0xa   :  { %p189_p3 = scmp.ne.s32.totalorder %s16_s10, %s188_s18  ;;  %p194_p5 = scmp.lt.s32.totalorder %s188_s18, %s188_s18 }
   0xc   :  { %p195_p6 = por %p194_p5, %p193_p4 }
   0xe   :  { %p196_p7 = pnand %p195_p6, %p189_p3 }
  0x10   :  { %199 = shalt.err (!%p196_p7)
}
  0x11   :  { %s251_s19 = smov 128   ;;  %s252_s20 = smov 8  }
  0x12   :  { %21 = dma.hbm_to_vmem [thread:$0]  %s315_s0, 256, %s16_s10, [#allocation3], %s251_s19, %s251_s19, %s252_s20  }
  0x13   :  { %s253_s23 = smov [#allocation5]   ;;  %s200_s27 = scalar_lea.hbm %s316_s1, 1024 }
  0x14   :  { %s27_s24 = sshll.u32 %s253_s23, 4  ;;  %p201_p8 = scmp.ne.s32.totalorder %s316_s1, %s200_s27  ;;  %s28_s24 = int_to_ptr.vmem [resolvable:$true] %s27_s24 }
  0x15   :  { %p204_p9 = scmp.lt.u32.totalorder %s200_s27, %s316_s1 }
  0x17   :  { %p206_p10 = pnand %p204_p9, %p201_p8 }
  0x19   :  { %209 = shalt.err (!%p206_p10)
}
  0x1a   :  { %s210_s4 = scalar_lea.vmem %s28_s24, 1024  ;;  %p215_p12 = scmp.lt.s32.totalorder %s28_s24, %s28_s24 }
  0x1b   :  { %p211_p11 = scmp.ne.s32.totalorder %s28_s24, %s210_s4  ;;  %p216_p13 = scmp.lt.s32.totalorder %s210_s4, %s210_s4 }
  0x1d   :  { %p217_p0 = por %p216_p13, %p215_p12 }
  0x1f   :  { %p218_p1 = pnand %p217_p0, %p211_p11 }
  0x21   :  { %221 = shalt.err (!%p218_p1)
}
  0x22   :  { %s254_s0 = smov 256   ;;  %s255_s5 = smov 16  }
  0x23   :  { %33 = dma.hbm_to_vmem [thread:$0]  %s316_s1, 1024, %s28_s24, [#allocation6], %s254_s0, %s254_s0, %s255_s5  }
  0x24   :  { %244 = dma.done.wait [#allocation3], 256  }
  0x25   :  { %245 = vsyncadd [#allocation3], 4294967040 }
  0x26   :  { %246 = dma.done.wait [#allocation6], 1024  }
  0x27   :  { %247 = vsyncadd [#allocation6], 4294966272  ;;  %v256_v0 = vmov 0.0   ;;  %v43_v1 = vld [vmem:[#allocation5 + $0x8] sm:$0xff]  ;;  %v45_v2 = vld [vmem:[#allocation5 + $0x18] sm:$0xff]  ;;  %vm50_vm0 = vcmask 261120  }
  0x28   :  { %121 = vmatprep.mubr.f32.mxu0 %v256_v0  ;;  %127 = vmatprep.mubr.f32.mxu1 %v256_v0  ;;  %v42_v3 = vld [vmem:[#allocation5] sm:$0xff]  ;;  %v158_v4 = vpack.c.bf16 %v45_v2, %v43_v1  ;;  %v44_v5 = vld [vmem:[#allocation5 + $0x10] sm:$0xff]  ;;  %v47_v6 = vld [vmem:[#allocation5 + $0x28] sm:$0xff]  ;;  %s257_s1 = smov [#allocation7]  }
  0x29   :  { %v49_v7 = vld [vmem:[#allocation5 + $0x38] sm:$0xff]  ;;  %v160_v8 = vpack.c.bf16 %v44_v5, %v42_v3  ;;  %v46_v10 = vld [vmem:[#allocation5 + $0x20] sm:$0xff]  ;;  %v48_v11 = vld [vmem:[#allocation5 + $0x30] sm:$0xff]  ;;  %s143_s8 = sshll.u32 %s257_s1, 4  ;;  %s144_s8 = int_to_ptr.vmem [resolvable:$true] %s143_s8 }
  0x2a   :  { %v162_v9 = vpack.c.bf16 %v49_v7, %v47_v6  ;;  %159 = vmatprep.subr.bf16.mxu0 %v158_v4  ;;  %166 = vmatprep.subr.bf16.mxu1 %v158_v4  ;;  %v164_v12 = vpack.c.bf16 %v48_v11, %v46_v10  ;;  %v40_v13 = vld [vmem:[#allocation2] sm:$0xff]  ;;  %v41_v14 = vld [vmem:[#allocation2 + $0x8] sm:$0xff]  ;;  %s222_s9 = scalar_lea.vmem %s144_s8, 512  ;;  %p227_p3 = scmp.lt.s32.totalorder %s144_s8, %s144_s8 }
  0x2b   :  { %161 = vmatpush1.bf16.msra.mxu0 %v160_v8  ;;  %168 = vmatpush1.bf16.msra.mxu1 %v160_v8  ;;  %p223_p2 = scmp.ne.s32.totalorder %s144_s8, %s222_s9  ;;  %p228_p4 = scmp.lt.s32.totalorder %s222_s9, %s222_s9 }
  0x2c   :  { %163 = vmatprep.subr.bf16.mxu0 %v162_v9  ;;  %167 = vmatprep.subr.bf16.mxu1 %v162_v9 }
  0x2d   :  { %p229_p5 = por %p228_p4, %p227_p3 }
  0x2f   :  { %165 = vmatpush1.bf16.msra.mxu0 %v164_v12  ;;  %169 = vmatpush1.bf16.msra.mxu1 %v164_v12  ;;  %p230_p6 = pnand %p229_p5, %p223_p2 }
  0x32   :  { %156 = vmatmul.mubr.msk.f32.vlgmr.msra.gmra.mrb[0].mxu0 %vm50_vm0, %v40_v13  ;;  %157 = vmatmul.mubr.msk.f32.vlgmr.msra.gmra.mrb[0].mxu1 %vm50_vm0, %v41_v14 }
 0x105   :  { %v123_v15 = vpop.f32.mrb[0].mxu0  ;;  %v129_v16 = vpop.f32.mrb[0].mxu1 }
 0x106   :  { %134 = vst [vmem:[#allocation7] sm:$0xff] %v123_v15  ;;  %136 = vst [vmem:[#allocation7 + $0x10] sm:$0xff] %v129_v16  ;;  %v125_v17 = vpop.f32.mrb[1].mxu0  ;;  %v131_v18 = vpop.f32.mrb[1].mxu1 }
 0x107   :  { %135 = vst [vmem:[#allocation7 + $0x8] sm:$0xff] %v125_v17  ;;  %137 = vst [vmem:[#allocation7 + $0x18] sm:$0xff] %v131_v18 }
 0x108   :  { %233 = shalt.err (!%p230_p6)
}
 0x109   :  { %s234_s12 = scalar_lea.hbm %s317_s2, 512 }
 0x10a   :  { %p235_p7 = scmp.ne.s32.totalorder %s317_s2, %s234_s12  ;;  %p238_p8 = scmp.lt.u32.totalorder %s234_s12, %s317_s2 }
 0x10c   :  { %p240_p9 = pnand %p238_p8, %p235_p7 }
 0x10e   :  { %243 = shalt.err (!%p240_p9)
}
 0x10f   :  { %149 = dma.vmem_to_hbm [thread:$0]  %s144_s8, 512, %s317_s2, [#allocation4], %s254_s0, %s254_s0, %s255_s5  }
 0x110   :  { %248 = dma.done.wait [#allocation4], 512  }
 0x111   :  { %249 = vsyncadd [#allocation4], 4294966784 }
 0x112   :  { %153 = vsyncpa [#allocation3], 1 }
 0x113   :  { %154 = vsyncpa [#allocation6], 1 }
 0x114   :  { %155 = vsyncpa [#allocation4], 1 }

</bundles_post_ra>
